<compile_context>
chip_gen: v6e
topology: v6e:2x2x1
jax: 0.10.0
libtpu: 0.0.40
codegen_flags: <defaults>
</compile_context>

<pallas_src>
import jax
import jax.numpy as jnp
from jax.experimental import pallas as pl
from jax.experimental.pallas import tpu as pltpu

HIDDEN = 10
PARAM_LEN = 32     # [w1(10), b1(10), w2(10), b2(1), pad(1)] packed f32 scalars

# Fixed (TM, TN) tile buckets -> at most len(_BUCKETS) compiled variants.
_BUCKETS = (
    (8, 128),       # <= 1 Ki elems   (4 KiB block)    tiny batches
    (8, 1024),      # <= 8 Ki elems   (32 KiB block)
    (64, 2048),     # <= 128 Ki elems (512 KiB block)
    (256, 2048),    # streaming bucket (2 MiB block), grid over batch tiles
)


def mlp_kernel(p_ref, x_ref, o_ref):
    # p_ref: (32,) f32 in SMEM  -> p[0:10]=w1, p[10:20]=b1, p[20:30]=w2, p[30]=b2
    # x_ref / o_ref: (TM, TN) f32 blocks in VMEM (batch elements, lane-dense).
    x = x_ref[...]
    # Hidden unit 0, with the output bias fused into the accumulator init.
    acc = jnp.maximum(p_ref[0] * x + p_ref[10], 0.0) * p_ref[20] + p_ref[30]
    # Remaining 9 real hidden units, fully unrolled (fixed trip count of 10,
    # no padded units in the compute path).
    for j in range(1, HIDDEN):
        acc = acc + p_ref[20 + j] * jnp.maximum(p_ref[j] * x + p_ref[10 + j], 0.0)
    o_ref[...] = acc.astype(o_ref.dtype)


def _pick_bucket(n):
    for tm, tn in _BUCKETS:
        if n <= tm * tn:
            return tm, tn
    return _BUCKETS[-1]


def _pack_params(w1, b1, w2, b2):
    """Flatten all parameters into one (32,) f32 array for SMEM."""
    w1f = w1.reshape(HIDDEN).astype(jnp.float32)
    b1f = b1.reshape(HIDDEN).astype(jnp.float32)
    w2f = w2.reshape(HIDDEN).astype(jnp.float32)
    b2f = b2.reshape(1).astype(jnp.float32)
    pad = jnp.zeros((PARAM_LEN - 3 * HIDDEN - 1,), jnp.float32)
    return jnp.concatenate([w1f, b1f, w2f, b2f, pad])          # (32,)


def regression_model_forward(x, w1, b1, w2, b2, *, bucket=None):
    """x: (N, 1) float32 (PyTorch nn.Linear convention). Returns (N, 1) f32."""
    n = x.shape[0]
    tm, tn = bucket if bucket is not None else _pick_bucket(n)
    block = tm * tn
    n_pad = ((n + block - 1) // block) * block
    rows = n_pad // tn

    # Batch as a 2-D slab: pad to a whole number of (TM, TN) blocks.
    # Padded entries compute garbage (relu(b1)·w2 + b2) and are sliced off.
    xs = jnp.pad(x.astype(jnp.float32).reshape(-1),
                 (0, n_pad - n)).reshape(rows, tn)
    params = _pack_params(w1, b1, w2, b2)

    out = pl.pallas_call(
        mlp_kernel,
        out_shape=jax.ShapeDtypeStruct((rows, tn), jnp.float32),
        grid_spec=pltpu.PrefetchScalarGridSpec(
            num_scalar_prefetch=0,
            grid=(rows // tm,),
            in_specs=[
                pl.BlockSpec(memory_space=pltpu.MemorySpace.SMEM),  # params
                pl.BlockSpec((tm, tn), lambda i: (i, 0)),           # x tile
            ],
            out_specs=pl.BlockSpec((tm, tn), lambda i: (i, 0)),
        ),
        compiler_params=pltpu.CompilerParams(
            dimension_semantics=("parallel",)),
    )(params, xs)

    return out.reshape(-1)[:n].reshape(n, 1)


def init_params(key):
    # Deterministic init mimicking nn.Linear's U(-1/sqrt(fan_in), 1/sqrt(fan_in)).
    k1, k2, k3, k4 = jax.random.split(key, 4)
    bound1 = 1.0                     # hidden layer: fan_in = 1
    bound2 = 1.0 / jnp.sqrt(10.0)    # output layer: fan_in = 10
    # Stored as (in_features, out_features) == transpose of PyTorch's weight.
    w1 = jax.random.uniform(k1, (1, HIDDEN), jnp.float32, -bound1, bound1)
    b1 = jax.random.uniform(k2, (1, HIDDEN), jnp.float32, -bound1, bound1)
    w2 = jax.random.uniform(k3, (HIDDEN, 1), jnp.float32, -bound2, bound2)
    b2 = jax.random.uniform(k4, (1, 1), jnp.float32, -bound2, bound2)
    return w1, b1, w2, b2


def reference_forward(x, w1, b1, w2, b2):
    h = jnp.maximum(x @ w1 + b1, 0.0)
    return h @ w2 + b2


if __name__ == "__main__":
    key = jax.random.PRNGKey(0)
    k_params, k_x1, k_x2 = jax.random.split(key, 3)
    w1, b1, w2, b2 = init_params(k_params)

    # Small-batch check (single (8, 128) block).
    batch = 8
    x = jax.random.normal(k_x1, (batch, 1), jnp.float32)
    out = jax.block_until_ready(regression_model_forward(x, w1, b1, w2, b2))
    ref = reference_forward(x, w1, b1, w2, b2)
    assert out.shape == (batch, 1)
    assert jnp.allclose(out, ref, atol=1e-5, rtol=1e-5)

    # Multi-step grid path: 3000 elems with the smallest bucket -> 3 grid steps,
    # non-multiple batch exercises the padding + slice-off path.
    batch2 = 3000
    x2 = jax.random.normal(k_x2, (batch2, 1), jnp.float32)
    out2 = jax.block_until_ready(
        regression_model_forward(x2, w1, b1, w2, b2, bucket=(8, 128)))
    ref2 = reference_forward(x2, w1, b1, w2, b2)
    assert out2.shape == (batch2, 1)
    assert jnp.allclose(out2, ref2, atol=1e-5, rtol=1e-5)

    print("KERNEL_OK")
</pallas_src>

<mosaic_0001>
module attributes {stable_mosaic.version = 11 : i64} {
  func.func @mlp_kernel(%arg0: i32, %arg1: memref<32xf32, #tpu.memory_space<smem>>, %arg2: memref<8x128xf32, #tpu.memory_space<vmem>>, %arg3: memref<8x128xf32, #tpu.memory_space<vmem>>) attributes {dimension_semantics = [#tpu.dimension_semantics<parallel>], iteration_bounds = array<i64: 1>, scalar_prefetch = 0 : i64, scratch_operands = 0 : i64, tpu.core_type = #tpu.core_type<tc>, window_params = [{transform_indices = @transform_0, window_bounds = array<i64: 32>}, {transform_indices = @transform_1, window_bounds = array<i64: 8, 128>}, {transform_indices = @transform_2, window_bounds = array<i64: 8, 128>}]} {
    %c0 = arith.constant 0 : index
    %c0_0 = arith.constant 0 : index
    %0 = vector.load %arg2[%c0, %c0_0] : memref<8x128xf32, #tpu.memory_space<vmem>>, vector<8x128xf32>
    %c0_1 = arith.constant 0 : index
    %1 = memref.load %arg1[%c0_1] : memref<32xf32, #tpu.memory_space<smem>>
    %2 = vector.broadcast %1 : f32 to vector<8x128xf32>
    %3 = arith.mulf %2, %0 : vector<8x128xf32>
    %c10 = arith.constant 10 : index
    %4 = memref.load %arg1[%c10] : memref<32xf32, #tpu.memory_space<smem>>
    %5 = vector.broadcast %4 : f32 to vector<8x128xf32>
    %6 = arith.addf %3, %5 : vector<8x128xf32>
    %cst = arith.constant 0.000000e+00 : f32
    %7 = vector.broadcast %cst : f32 to vector<8x128xf32>
    %8 = arith.maximumf %6, %7 : vector<8x128xf32>
    %c20 = arith.constant 20 : index
    %9 = memref.load %arg1[%c20] : memref<32xf32, #tpu.memory_space<smem>>
    %10 = vector.broadcast %9 : f32 to vector<8x128xf32>
    %11 = arith.mulf %8, %10 : vector<8x128xf32>
    %c30 = arith.constant 30 : index
    %12 = memref.load %arg1[%c30] : memref<32xf32, #tpu.memory_space<smem>>
    %13 = vector.broadcast %12 : f32 to vector<8x128xf32>
    %14 = arith.addf %11, %13 : vector<8x128xf32>
    %c21 = arith.constant 21 : index
    %15 = memref.load %arg1[%c21] : memref<32xf32, #tpu.memory_space<smem>>
    %c1 = arith.constant 1 : index
    %16 = memref.load %arg1[%c1] : memref<32xf32, #tpu.memory_space<smem>>
    %17 = vector.broadcast %16 : f32 to vector<8x128xf32>
    %18 = arith.mulf %17, %0 : vector<8x128xf32>
    %c11 = arith.constant 11 : index
    %19 = memref.load %arg1[%c11] : memref<32xf32, #tpu.memory_space<smem>>
    %20 = vector.broadcast %19 : f32 to vector<8x128xf32>
    %21 = arith.addf %18, %20 : vector<8x128xf32>
    %cst_2 = arith.constant 0.000000e+00 : f32
    %22 = vector.broadcast %cst_2 : f32 to vector<8x128xf32>
    %23 = arith.maximumf %21, %22 : vector<8x128xf32>
    %24 = vector.broadcast %15 : f32 to vector<8x128xf32>
    %25 = arith.mulf %24, %23 : vector<8x128xf32>
    %26 = arith.addf %14, %25 : vector<8x128xf32>
    %c22 = arith.constant 22 : index
    %27 = memref.load %arg1[%c22] : memref<32xf32, #tpu.memory_space<smem>>
    %c2 = arith.constant 2 : index
    %28 = memref.load %arg1[%c2] : memref<32xf32, #tpu.memory_space<smem>>
    %29 = vector.broadcast %28 : f32 to vector<8x128xf32>
    %30 = arith.mulf %29, %0 : vector<8x128xf32>
    %c12 = arith.constant 12 : index
    %31 = memref.load %arg1[%c12] : memref<32xf32, #tpu.memory_space<smem>>
    %32 = vector.broadcast %31 : f32 to vector<8x128xf32>
    %33 = arith.addf %30, %32 : vector<8x128xf32>
    %cst_3 = arith.constant 0.000000e+00 : f32
    %34 = vector.broadcast %cst_3 : f32 to vector<8x128xf32>
    %35 = arith.maximumf %33, %34 : vector<8x128xf32>
    %36 = vector.broadcast %27 : f32 to vector<8x128xf32>
    %37 = arith.mulf %36, %35 : vector<8x128xf32>
    %38 = arith.addf %26, %37 : vector<8x128xf32>
    %c23 = arith.constant 23 : index
    %39 = memref.load %arg1[%c23] : memref<32xf32, #tpu.memory_space<smem>>
    %c3 = arith.constant 3 : index
    %40 = memref.load %arg1[%c3] : memref<32xf32, #tpu.memory_space<smem>>
    %41 = vector.broadcast %40 : f32 to vector<8x128xf32>
    %42 = arith.mulf %41, %0 : vector<8x128xf32>
    %c13 = arith.constant 13 : index
    %43 = memref.load %arg1[%c13] : memref<32xf32, #tpu.memory_space<smem>>
    %44 = vector.broadcast %43 : f32 to vector<8x128xf32>
    %45 = arith.addf %42, %44 : vector<8x128xf32>
    %cst_4 = arith.constant 0.000000e+00 : f32
    %46 = vector.broadcast %cst_4 : f32 to vector<8x128xf32>
    %47 = arith.maximumf %45, %46 : vector<8x128xf32>
    %48 = vector.broadcast %39 : f32 to vector<8x128xf32>
    %49 = arith.mulf %48, %47 : vector<8x128xf32>
    %50 = arith.addf %38, %49 : vector<8x128xf32>
    %c24 = arith.constant 24 : index
    %51 = memref.load %arg1[%c24] : memref<32xf32, #tpu.memory_space<smem>>
    %c4 = arith.constant 4 : index
    %52 = memref.load %arg1[%c4] : memref<32xf32, #tpu.memory_space<smem>>
    %53 = vector.broadcast %52 : f32 to vector<8x128xf32>
    %54 = arith.mulf %53, %0 : vector<8x128xf32>
    %c14 = arith.constant 14 : index
    %55 = memref.load %arg1[%c14] : memref<32xf32, #tpu.memory_space<smem>>
    %56 = vector.broadcast %55 : f32 to vector<8x128xf32>
    %57 = arith.addf %54, %56 : vector<8x128xf32>
    %cst_5 = arith.constant 0.000000e+00 : f32
    %58 = vector.broadcast %cst_5 : f32 to vector<8x128xf32>
    %59 = arith.maximumf %57, %58 : vector<8x128xf32>
    %60 = vector.broadcast %51 : f32 to vector<8x128xf32>
    %61 = arith.mulf %60, %59 : vector<8x128xf32>
    %62 = arith.addf %50, %61 : vector<8x128xf32>
    %c25 = arith.constant 25 : index
    %63 = memref.load %arg1[%c25] : memref<32xf32, #tpu.memory_space<smem>>
    %c5 = arith.constant 5 : index
    %64 = memref.load %arg1[%c5] : memref<32xf32, #tpu.memory_space<smem>>
    %65 = vector.broadcast %64 : f32 to vector<8x128xf32>
    %66 = arith.mulf %65, %0 : vector<8x128xf32>
    %c15 = arith.constant 15 : index
    %67 = memref.load %arg1[%c15] : memref<32xf32, #tpu.memory_space<smem>>
    %68 = vector.broadcast %67 : f32 to vector<8x128xf32>
    %69 = arith.addf %66, %68 : vector<8x128xf32>
    %cst_6 = arith.constant 0.000000e+00 : f32
    %70 = vector.broadcast %cst_6 : f32 to vector<8x128xf32>
    %71 = arith.maximumf %69, %70 : vector<8x128xf32>
    %72 = vector.broadcast %63 : f32 to vector<8x128xf32>
    %73 = arith.mulf %72, %71 : vector<8x128xf32>
    %74 = arith.addf %62, %73 : vector<8x128xf32>
    %c26 = arith.constant 26 : index
    %75 = memref.load %arg1[%c26] : memref<32xf32, #tpu.memory_space<smem>>
    %c6 = arith.constant 6 : index
    %76 = memref.load %arg1[%c6] : memref<32xf32, #tpu.memory_space<smem>>
    %77 = vector.broadcast %76 : f32 to vector<8x128xf32>
    %78 = arith.mulf %77, %0 : vector<8x128xf32>
    %c16 = arith.constant 16 : index
    %79 = memref.load %arg1[%c16] : memref<32xf32, #tpu.memory_space<smem>>
    %80 = vector.broadcast %79 : f32 to vector<8x128xf32>
    %81 = arith.addf %78, %80 : vector<8x128xf32>
    %cst_7 = arith.constant 0.000000e+00 : f32
    %82 = vector.broadcast %cst_7 : f32 to vector<8x128xf32>
    %83 = arith.maximumf %81, %82 : vector<8x128xf32>
    %84 = vector.broadcast %75 : f32 to vector<8x128xf32>
    %85 = arith.mulf %84, %83 : vector<8x128xf32>
    %86 = arith.addf %74, %85 : vector<8x128xf32>
    %c27 = arith.constant 27 : index
    %87 = memref.load %arg1[%c27] : memref<32xf32, #tpu.memory_space<smem>>
    %c7 = arith.constant 7 : index
    %88 = memref.load %arg1[%c7] : memref<32xf32, #tpu.memory_space<smem>>
    %89 = vector.broadcast %88 : f32 to vector<8x128xf32>
    %90 = arith.mulf %89, %0 : vector<8x128xf32>
    %c17 = arith.constant 17 : index
    %91 = memref.load %arg1[%c17] : memref<32xf32, #tpu.memory_space<smem>>
    %92 = vector.broadcast %91 : f32 to vector<8x128xf32>
    %93 = arith.addf %90, %92 : vector<8x128xf32>
    %cst_8 = arith.constant 0.000000e+00 : f32
    %94 = vector.broadcast %cst_8 : f32 to vector<8x128xf32>
    %95 = arith.maximumf %93, %94 : vector<8x128xf32>
    %96 = vector.broadcast %87 : f32 to vector<8x128xf32>
    %97 = arith.mulf %96, %95 : vector<8x128xf32>
    %98 = arith.addf %86, %97 : vector<8x128xf32>
    %c28 = arith.constant 28 : index
    %99 = memref.load %arg1[%c28] : memref<32xf32, #tpu.memory_space<smem>>
    %c8 = arith.constant 8 : index
    %100 = memref.load %arg1[%c8] : memref<32xf32, #tpu.memory_space<smem>>
    %101 = vector.broadcast %100 : f32 to vector<8x128xf32>
    %102 = arith.mulf %101, %0 : vector<8x128xf32>
    %c18 = arith.constant 18 : index
    %103 = memref.load %arg1[%c18] : memref<32xf32, #tpu.memory_space<smem>>
    %104 = vector.broadcast %103 : f32 to vector<8x128xf32>
    %105 = arith.addf %102, %104 : vector<8x128xf32>
    %cst_9 = arith.constant 0.000000e+00 : f32
    %106 = vector.broadcast %cst_9 : f32 to vector<8x128xf32>
    %107 = arith.maximumf %105, %106 : vector<8x128xf32>
    %108 = vector.broadcast %99 : f32 to vector<8x128xf32>
    %109 = arith.mulf %108, %107 : vector<8x128xf32>
    %110 = arith.addf %98, %109 : vector<8x128xf32>
    %c29 = arith.constant 29 : index
    %111 = memref.load %arg1[%c29] : memref<32xf32, #tpu.memory_space<smem>>
    %c9 = arith.constant 9 : index
    %112 = memref.load %arg1[%c9] : memref<32xf32, #tpu.memory_space<smem>>
    %113 = vector.broadcast %112 : f32 to vector<8x128xf32>
    %114 = arith.mulf %113, %0 : vector<8x128xf32>
    %c19 = arith.constant 19 : index
    %115 = memref.load %arg1[%c19] : memref<32xf32, #tpu.memory_space<smem>>
    %116 = vector.broadcast %115 : f32 to vector<8x128xf32>
    %117 = arith.addf %114, %116 : vector<8x128xf32>
    %cst_10 = arith.constant 0.000000e+00 : f32
    %118 = vector.broadcast %cst_10 : f32 to vector<8x128xf32>
    %119 = arith.maximumf %117, %118 : vector<8x128xf32>
    %120 = vector.broadcast %111 : f32 to vector<8x128xf32>
    %121 = arith.mulf %120, %119 : vector<8x128xf32>
    %122 = arith.addf %110, %121 : vector<8x128xf32>
    %c0_11 = arith.constant 0 : index
    %c0_12 = arith.constant 0 : index
    %123 = vector.load %arg3[%c0_11, %c0_12] : memref<8x128xf32, #tpu.memory_space<vmem>>, vector<8x128xf32>
    tpu.vector_store %arg3[%c0_11, %c0_12], %122 {strides = array<i32>} : memref<8x128xf32, #tpu.memory_space<vmem>>, vector<8x128xf32>,
    return
  }
  func.func @transform_0(%arg0: i32) -> i32 {
    %c0_i32 = arith.constant 0 : i32
    %c0_i32_0 = arith.constant 0 : i32
    return %c0_i32 : i32
  }
  func.func @transform_1(%arg0: i32) -> (i32, i32) {
    %c0_i32 = arith.constant 0 : i32
    %c0_i32_0 = arith.constant 0 : i32
    return %arg0, %c0_i32 : i32, i32
  }
  func.func @transform_2(%arg0: i32) -> (i32, i32) {
    %c0_i32 = arith.constant 0 : i32
    %c0_i32_0 = arith.constant 0 : i32
    return %arg0, %c0_i32 : i32, i32
  }
}

</mosaic_0001>

<bundles_post_ra>
// kernel: tpu_custom_call.1
= control target key start
LH: loop header
LB: loop body
LE: loop exit
PB: predicated region body
PF: predicated region fallthrough
CT: control target
= control target key end

     0   :  { %7 = vsyncpa [#allocation5], 0  ;;  %s309_s0 = inlined_call_operand.hbm [shape: f32[32], index: 0, kind: input, shape index: {}]   ;;  %s310_s1 = inlined_call_operand.hbm [shape: f32[8,128], index: 1, kind: input, shape index: {}]   ;;  %s311_s2 = inlined_call_operand.hbm [shape: f32[8,128], index: 2, kind: output, shape index: {}]  }
   0x1   :  { %8 = vsyncpa [#allocation3], 0 }
   0x2   :  { %9 = vsyncpa [#allocation4], 0  ;;  %s252_s9 = smov [#allocation2]   ;;  %s253_s12 = smov [#allocation6]  }
   0x3   :  { %17 = dma.hbm_to_smem %s309_s0, 16, %s252_s9, [#allocation5]  }
   0x4   :  { %s24_s13 = sshll.u32 %s253_s12, 4  ;;  %s25_s13 = int_to_ptr.vmem [resolvable:$true] %s24_s13 }
   0x5   :  { %s214_s14 = scalar_lea.vmem %s25_s13, 128  ;;  %p219_p1 = scmp.lt.s32.totalorder %s25_s13, %s25_s13 }
   0x6   :  { %p215_p0 = scmp.ne.s32.totalorder %s25_s13, %s214_s14  ;;  %p220_p2 = scmp.lt.s32.totalorder %s214_s14, %s214_s14 }
   0x8   :  { %p221_p3 = por %p220_p2, %p219_p1 }
   0xa   :  { %p222_p4 = pnand %p221_p3, %p215_p0 }
   0xc   :  { %225 = shalt.err (!%p222_p4)
}
   0xd   :  { %27 = dma.hbm_to_vmem [thread:$0]  %s310_s1, 128, %s25_s13, [#allocation3]  }
   0xe   :  { %246 = dma.done.wait [#allocation5], 16  }
   0xf   :  { %247 = vsyncadd [#allocation5], 4294967280 }
  0x10   :  { %248 = dma.done.wait [#allocation3], 128  }
  0x11   :  { %249 = vsyncadd [#allocation3], 4294967168 }
  0x12   :  { %34 = sfence }
  0x13   :  { %s36_s0 = sld [smem:[#allocation2]]  ;;  %v276_v0 = vld [vmem:[#allocation6] sm:$0xff] }
  0x14   :  { %s165_s17 = sld [smem:[#allocation2 + $0xa]] }
  0x15   :  { %s166_s18 = sld [smem:[#allocation2 + $0x14]] }
  0x16   :  { %s167_s19 = sld [smem:[#allocation2 + $0x1e]] }
  0x17   :  { %s169_s20 = sld [smem:[#allocation2 + $0x1]] }
  0x18   :  { %s170_s21 = sld [smem:[#allocation2 + $0xb]] }
  0x19   :  { %v37_v1 = vstv %s36_s0  ;;  %s168_s22 = sld [smem:[#allocation2 + $0x15]] }
  0x1a   :  { %v38_v2 = vmul.f32 %v37_v1, %v276_v0  ;;  %v40_v3 = vstv %s165_s17  ;;  %s172_s23 = sld [smem:[#allocation2 + $0x2]]  ;;  %s254_s17 = smov [#allocation7]  }
  0x1b   :  { %s173_s1 = sld [smem:[#allocation2 + $0xc]]  ;;  %v44_v5 = vstv %s166_s18  ;;  %s155_s18 = sshll.u32 %s254_s17, 4  ;;  %s156_s18 = int_to_ptr.vmem [resolvable:$true] %s155_s18 }
  0x1c   :  { %v41_v4 = vadd.f32 %v40_v3, %v38_v2  ;;  %s279_s24 = sld [smem:[#allocation2 + $0x16]]  ;;  %v47_v11 = vstv %s167_s19  ;;  %s226_s19 = scalar_lea.vmem %s156_s18, 128 }
  0x1d   :  { %v51_v7 = vstv %s169_s20  ;;  %s175_s25 = sld [smem:[#allocation2 + $0x3]]  ;;  %p227_p5 = scmp.ne.s32.totalorder %s156_s18, %s226_s19 }
  0x1e   :  { %v42_v6 = vmax.f32 %v41_v4, 0.0  ;;  %v52_v8 = vmul.f32 %v51_v7, %v276_v0  ;;  %v54_v9 = vstv %s170_s21  ;;  %s176_s26 = sld [smem:[#allocation2 + $0xd]]  ;;  %p231_p6 = scmp.lt.s32.totalorder %s156_s18, %s156_s18 }
  0x1f   :  { %s282_s27 = sld [smem:[#allocation2 + $0x17]]  ;;  %v57_v14 = vstv %s168_s22  ;;  %p232_p7 = scmp.lt.s32.totalorder %s226_s19, %s226_s19 }
  0x20   :  { %v45_v10 = vmul.f32 %v44_v5, %v42_v6  ;;  %v55_v12 = vadd.f32 %v54_v9, %v52_v8  ;;  %v62_v13 = vstv %s172_s23  ;;  %s178_s28 = sld [smem:[#allocation2 + $0x4]] }
  0x21   :  { %v63_v15 = vmul.f32 %v62_v13, %v276_v0  ;;  %v65_v16 = vstv %s173_s1  ;;  %s179_s29 = sld [smem:[#allocation2 + $0xe]]  ;;  %p233_p8 = por %p232_p7, %p231_p6 }
  0x22   :  { %v48_v17 = vadd.f32 %v47_v11, %v45_v10  ;;  %v56_v18 = vmax.f32 %v55_v12, 0.0  ;;  %s285_s30 = sld [smem:[#allocation2 + $0x18]]  ;;  %v68_v22 = vstv %s279_s24 }
  0x23   :  { %v66_v19 = vadd.f32 %v65_v16, %v63_v15  ;;  %v73_v20 = vstv %s175_s25  ;;  %s181_s3 = sld [smem:[#allocation2 + $0x5]]  ;;  %p234_p9 = pnand %p233_p8, %p227_p5 }
  0x24   :  { %v58_v21 = vmul.f32 %v57_v14, %v56_v18  ;;  %v74_v23 = vmul.f32 %v73_v20, %v276_v0  ;;  %v76_v24 = vstv %s176_s26  ;;  %s182_s4 = sld [smem:[#allocation2 + $0xf]] }
  0x25   :  { %v67_v25 = vmax.f32 %v66_v19, 0.0  ;;  %s289_s5 = sld [smem:[#allocation2 + $0x19]]  ;;  %v79_v30 = vstv %s282_s27 }
  0x26   :  { %v59_v26 = vadd.f32 %v58_v21, %v48_v17  ;;  %v77_v27 = vadd.f32 %v76_v24, %v74_v23  ;;  %v84_v28 = vstv %s178_s28  ;;  %s184_s6 = sld [smem:[#allocation2 + $0x6]] }
  0x27   :  { %v69_v29 = vmul.f32 %v68_v22, %v67_v25  ;;  %v85_v31 = vmul.f32 %v84_v28, %v276_v0  ;;  %v87_v32 = vstv %s179_s29  ;;  %s185_s7 = sld [smem:[#allocation2 + $0x10]] }
  0x28   :  { %v78_v33 = vmax.f32 %v77_v27, 0.0  ;;  %s293_s8 = sld [smem:[#allocation2 + $0x1a]]  ;;  %v90_v38 = vstv %s285_s30 }
  0x29   :  { %v70_v34 = vadd.f32 %v69_v29, %v59_v26  ;;  %v88_v35 = vadd.f32 %v87_v32, %v85_v31  ;;  %v95_v36 = vstv %s181_s3  ;;  %s187_s9 = sld [smem:[#allocation2 + $0x7]] }
  0x2a   :  { %v80_v37 = vmul.f32 %v79_v30, %v78_v33  ;;  %v96_v39 = vmul.f32 %v95_v36, %v276_v0  ;;  %v98_v40 = vstv %s182_s4  ;;  %s188_s10 = sld [smem:[#allocation2 + $0x11]] }
  0x2b   :  { %v89_v41 = vmax.f32 %v88_v35, 0.0  ;;  %s297_s11 = sld [smem:[#allocation2 + $0x1b]]  ;;  %v101_v46 = vstv %s289_s5 }
  0x2c   :  { %v81_v42 = vadd.f32 %v80_v37, %v70_v34  ;;  %v99_v43 = vadd.f32 %v98_v40, %v96_v39  ;;  %v106_v44 = vstv %s184_s6  ;;  %s190_s12 = sld [smem:[#allocation2 + $0x8]] }
  0x2d   :  { %v91_v45 = vmul.f32 %v90_v38, %v89_v41  ;;  %v107_v47 = vmul.f32 %v106_v44, %v276_v0  ;;  %v109_v48 = vstv %s185_s7  ;;  %s191_s13 = sld [smem:[#allocation2 + $0x12]] }
  0x2e   :  { %v100_v49 = vmax.f32 %v99_v43, 0.0  ;;  %s189_s14 = sld [smem:[#allocation2 + $0x1c]]  ;;  %v112_v54 = vstv %s293_s8 }
  0x2f   :  { %v92_v50 = vadd.f32 %v91_v45, %v81_v42  ;;  %v110_v51 = vadd.f32 %v109_v48, %v107_v47  ;;  %v117_v52 = vstv %s187_s9  ;;  %s193_s15 = sld [smem:[#allocation2 + $0x9]] }
  0x30   :  { %v102_v53 = vmul.f32 %v101_v46, %v100_v49  ;;  %v118_v55 = vmul.f32 %v117_v52, %v276_v0  ;;  %v120_v56 = vstv %s188_s10  ;;  %s194_s16 = sld [smem:[#allocation2 + $0x13]] }
  0x31   :  { %v111_v57 = vmax.f32 %v110_v51, 0.0  ;;  %s192_s0 = sld [smem:[#allocation2 + $0x1d]]  ;;  %v123_v62 = vstv %s297_s11 }
  0x32   :  { %v103_v58 = vadd.f32 %v102_v53, %v92_v50  ;;  %v121_v59 = vadd.f32 %v120_v56, %v118_v55  ;;  %v128_v60 = vstv %s190_s12 }
  0x33   :  { %v113_v61 = vmul.f32 %v112_v54, %v111_v57  ;;  %v129_v63 = vmul.f32 %v128_v60, %v276_v0  ;;  %v131_v1 = vstv %s191_s13 }
  0x34   :  { %v122_v2 = vmax.f32 %v121_v59, 0.0  ;;  %v134_v7 = vstv %s189_s14 }
  0x35   :  { %v114_v3 = vadd.f32 %v113_v61, %v103_v58  ;;  %v132_v4 = vadd.f32 %v131_v1, %v129_v63  ;;  %v139_v5 = vstv %s193_s15 }
  0x36   :  { %v124_v6 = vmul.f32 %v123_v62, %v122_v2  ;;  %v140_v8 = vmul.f32 %v139_v5, %v276_v0  ;;  %v142_v9 = vstv %s194_s16 }
  0x37   :  { %v133_v10 = vmax.f32 %v132_v4, 0.0  ;;  %v145_v14 = vstv %s192_s0 }
  0x38   :  { %v125_v11 = vadd.f32 %v124_v6, %v114_v3  ;;  %v143_v12 = vadd.f32 %v142_v9, %v140_v8 }
  0x39   :  { %v135_v13 = vmul.f32 %v134_v7, %v133_v10 }
  0x3a   :  { %v144_v15 = vmax.f32 %v143_v12, 0.0 }
  0x3b   :  { %v136_v16 = vadd.f32 %v135_v13, %v125_v11 }
  0x3c   :  { %v146_v17 = vmul.f32 %v145_v14, %v144_v15 }
  0x3e   :  { %v147_v18 = vadd.f32 %v146_v17, %v136_v16 }
  0x40   :  { %148 = vst [vmem:[#allocation7] sm:$0xff] %v147_v18 }
  0x41   :  { %237 = shalt.err (!%p234_p9)
}
  0x42   :  { %158 = dma.vmem_to_hbm [thread:$0]  %s156_s18, 128, %s311_s2, [#allocation4]  }
  0x43   :  { %250 = dma.done.wait [#allocation4], 128  }
  0x44   :  { %251 = vsyncadd [#allocation4], 4294967168 }
  0x45   :  { %162 = vsyncpa [#allocation3], 1 }
  0x46   :  { %163 = vsyncpa [#allocation4], 1 }
  0x47   :  { %164 = vsyncpa [#allocation5], 1 }

</bundles_post_ra>
